<compile_context>
chip_gen: v7x
topology: tpu7x:2x2x1
jax: 0.10.0
libtpu: 0.0.40
codegen_flags: <defaults>
</compile_context>

<pallas_src>
import jax
import jax.numpy as jnp
from jax.experimental import pallas as pl
from jax.experimental.pallas import tpu as pltpu


def _round_up(x, m):
    return (x + m - 1) // m * m


def _mlp_kernel(x_ref, w1_ref, b1_ref, w2_ref, b2_ref, w3_ref, b3_ref, o_ref):
    # fc1 (+ folded bn1 & bias) -> relu   (dropout1 = identity in eval)
    xb = x_ref[...].astype(jnp.bfloat16)
    h1 = jnp.dot(xb, w1_ref[...], preferred_element_type=jnp.float32)
    h1 = jnp.maximum(h1 + b1_ref[...], 0.0)

    # fc2 (+ folded bn2 & bias) -> relu   (dropout2 = identity in eval)
    h2 = jnp.dot(h1.astype(jnp.bfloat16), w2_ref[...],
                 preferred_element_type=jnp.float32)
    h2 = jnp.maximum(h2 + b2_ref[...], 0.0)

    # fc3
    out = jnp.dot(h2.astype(jnp.bfloat16), w3_ref[...],
                  preferred_element_type=jnp.float32)
    o_ref[...] = (out + b3_ref[...]).astype(o_ref.dtype)


def prepare_params(raw):
    """Fold eval-mode BatchNorm into fc1/fc2, pad hidden dims to 128, cast to bf16."""
    eps = raw["bn_eps"]

    s1 = raw["bn1_gamma"] / jnp.sqrt(raw["bn1_var"] + eps)
    w1f = raw["w1"] * s1[None, :]
    b1f = (raw["b1"] - raw["bn1_mean"]) * s1 + raw["bn1_beta"]

    s2 = raw["bn2_gamma"] / jnp.sqrt(raw["bn2_var"] + eps)
    w2f = raw["w2"] * s2[None, :]
    b2f = (raw["b2"] - raw["bn2_mean"]) * s2 + raw["bn2_beta"]

    w3f, b3f = raw["w3"], raw["b3"]

    # Pad hidden1 to a multiple of 128 (lane-dense h1 / aligned fc2 K).
    h1 = w1f.shape[1]
    h1p = _round_up(h1, 128)
    if h1p != h1:
        w1f = jnp.pad(w1f, ((0, 0), (0, h1p - h1)))
        b1f = jnp.pad(b1f, (0, h1p - h1))
        w2f = jnp.pad(w2f, ((0, h1p - h1), (0, 0)))

    # Pad hidden2 to a multiple of 128 (lane-dense h2 / aligned fc3 K).
    h2 = w2f.shape[1]
    h2p = _round_up(h2, 128)
    if h2p != h2:
        w2f = jnp.pad(w2f, ((0, 0), (0, h2p - h2)))
        b2f = jnp.pad(b2f, (0, h2p - h2))
        w3f = jnp.pad(w3f, ((0, h2p - h2), (0, 0)))

    return {
        "w1": w1f.astype(jnp.bfloat16), "b1": b1f.reshape(1, -1).astype(jnp.float32),
        "w2": w2f.astype(jnp.bfloat16), "b2": b2f.reshape(1, -1).astype(jnp.float32),
        "w3": w3f.astype(jnp.bfloat16), "b3": b3f.reshape(1, -1).astype(jnp.float32),
    }


def powerful_ordinal_nn_forward(x, p, *, block_b=1024):
    """x: (B, in_features) float32. p: output of prepare_params()."""
    B, F = x.shape
    w1, b1 = p["w1"], p["b1"]
    w2, b2 = p["w2"], p["b2"]
    w3, b3 = p["w3"], p["b3"]
    assert w1.shape[0] == F, (w1.shape, F)
    H1 = w1.shape[1]
    H2 = w2.shape[1]
    OUT = w3.shape[1]

    # Batch tile: multiple of 8 (f32 sublane), capped at block_b.
    tb = min(block_b, _round_up(B, 8))
    b_pad = _round_up(B, tb)
    xp = x if b_pad == B else jnp.pad(x, ((0, b_pad - B), (0, 0)))

    grid = (b_pad // tb,)

    flops = 2 * b_pad * (F * H1 + H1 * H2 + H2 * OUT)
    bytes_accessed = (b_pad * F * 4 + b_pad * OUT * 4
                      + (w1.size + w2.size + w3.size) * 2
                      + (b1.size + b2.size + b3.size) * 4)

    out = pl.pallas_call(
        _mlp_kernel,
        out_shape=jax.ShapeDtypeStruct((b_pad, OUT), jnp.float32),
        grid=grid,
        in_specs=[
            pl.BlockSpec((tb, F), lambda i: (i, 0)),        # x: pipelined per batch tile
            pl.BlockSpec((F, H1), lambda i: (0, 0)),        # weights/biases: VMEM-resident
            pl.BlockSpec((1, H1), lambda i: (0, 0)),
            pl.BlockSpec((H1, H2), lambda i: (0, 0)),
            pl.BlockSpec((1, H2), lambda i: (0, 0)),
            pl.BlockSpec((H2, OUT), lambda i: (0, 0)),
            pl.BlockSpec((1, OUT), lambda i: (0, 0)),
        ],
        out_specs=pl.BlockSpec((tb, OUT), lambda i: (i, 0)),
        compiler_params=pltpu.CompilerParams(
            dimension_semantics=("parallel",)),
        cost_estimate=pl.CostEstimate(
            flops=flops, transcendentals=0, bytes_accessed=int(bytes_accessed)),
    )(xp, w1, b1, w2, b2, w3, b3)

    return out[:B]


def init_raw_params(key, in_features=154, hidden1=128, hidden2=64, out_features=2):
    """PyTorch-equivalent parameters. Linear weights stored as (in, out)."""
    ks = jax.random.split(key, 14)
    p = {"bn_eps": 1e-5}
    p["w1"] = jax.random.normal(ks[0], (in_features, hidden1), jnp.float32) * 0.05
    p["b1"] = jax.random.normal(ks[1], (hidden1,), jnp.float32) * 0.05
    p["w2"] = jax.random.normal(ks[2], (hidden1, hidden2), jnp.float32) * 0.05
    p["b2"] = jax.random.normal(ks[3], (hidden2,), jnp.float32) * 0.05
    p["w3"] = jax.random.normal(ks[4], (hidden2, out_features), jnp.float32) * 0.05
    p["b3"] = jax.random.normal(ks[5], (out_features,), jnp.float32) * 0.05
    # Non-trivial BatchNorm running stats / affine params (eval mode).
    p["bn1_gamma"] = 1.0 + 0.1 * jax.random.normal(ks[6], (hidden1,), jnp.float32)
    p["bn1_beta"] = 0.1 * jax.random.normal(ks[7], (hidden1,), jnp.float32)
    p["bn1_mean"] = 0.1 * jax.random.normal(ks[8], (hidden1,), jnp.float32)
    p["bn1_var"] = 1.0 + 0.1 * jax.random.uniform(ks[9], (hidden1,), jnp.float32)
    p["bn2_gamma"] = 1.0 + 0.1 * jax.random.normal(ks[10], (hidden2,), jnp.float32)
    p["bn2_beta"] = 0.1 * jax.random.normal(ks[11], (hidden2,), jnp.float32)
    p["bn2_mean"] = 0.1 * jax.random.normal(ks[12], (hidden2,), jnp.float32)
    p["bn2_var"] = 1.0 + 0.1 * jax.random.uniform(ks[13], (hidden2,), jnp.float32)
    return p


def reference_forward(x, raw):
    """Pure-JAX f32 reference (eval-mode BN, identity dropout)."""
    eps = raw["bn_eps"]
    h = x @ raw["w1"] + raw["b1"]
    h = (h - raw["bn1_mean"]) / jnp.sqrt(raw["bn1_var"] + eps) * raw["bn1_gamma"] + raw["bn1_beta"]
    h = jnp.maximum(h, 0.0)
    h = h @ raw["w2"] + raw["b2"]
    h = (h - raw["bn2_mean"]) / jnp.sqrt(raw["bn2_var"] + eps) * raw["bn2_gamma"] + raw["bn2_beta"]
    h = jnp.maximum(h, 0.0)
    return h @ raw["w3"] + raw["b3"]


if __name__ == "__main__":
    key = jax.random.PRNGKey(0)
    k_x, k_p = jax.random.split(key)

    B, IN_FEATURES = 8, 154
    x = jax.random.normal(k_x, (B, IN_FEATURES), jnp.float32)
    raw = init_raw_params(k_p, in_features=IN_FEATURES)
    params = prepare_params(raw)

    out = jax.jit(powerful_ordinal_nn_forward)(x, params)
    out = jax.block_until_ready(out)

    ref = reference_forward(x, raw)
    assert out.shape == (B, 2), out.shape
    # bf16 matmul operands (f32 accumulation) -> loosen tolerance vs f32 reference.
    assert jnp.allclose(out, ref, atol=3e-2, rtol=3e-2), (
        "mismatch vs reference", float(jnp.max(jnp.abs(out - ref))))

    print("KERNEL_OK")
</pallas_src>

<mosaic_0001>
module attributes {stable_mosaic.version = 11 : i64} {
  func.func @_mlp_kernel(%arg0: i32, %arg1: memref<8x154xf32, #tpu.memory_space<vmem>>, %arg2: memref<154x128xbf16, #tpu.memory_space<vmem>>, %arg3: memref<1x128xf32, #tpu.memory_space<vmem>>, %arg4: memref<128x128xbf16, #tpu.memory_space<vmem>>, %arg5: memref<1x128xf32, #tpu.memory_space<vmem>>, %arg6: memref<128x2xbf16, #tpu.memory_space<vmem>>, %arg7: memref<1x2xf32, #tpu.memory_space<vmem>>, %arg8: memref<8x2xf32, #tpu.memory_space<vmem>>) attributes {dimension_semantics = [#tpu.dimension_semantics<parallel>], iteration_bounds = array<i64: 1>, scalar_prefetch = 0 : i64, scratch_operands = 0 : i64, tpu.core_type = #tpu.core_type<tc>, window_params = [{transform_indices = @transform_0, window_bounds = array<i64: 8, 154>}, {pipeline_mode = #tpu.pipeline_mode<synchronous>, transform_indices = @transform_1, window_bounds = array<i64: 154, 128>}, {pipeline_mode = #tpu.pipeline_mode<synchronous>, transform_indices = @transform_2, window_bounds = array<i64: 1, 128>}, {pipeline_mode = #tpu.pipeline_mode<synchronous>, transform_indices = @transform_3, window_bounds = array<i64: 128, 128>}, {pipeline_mode = #tpu.pipeline_mode<synchronous>, transform_indices = @transform_4, window_bounds = array<i64: 1, 128>}, {pipeline_mode = #tpu.pipeline_mode<synchronous>, transform_indices = @transform_5, window_bounds = array<i64: 128, 2>}, {pipeline_mode = #tpu.pipeline_mode<synchronous>, transform_indices = @transform_6, window_bounds = array<i64: 1, 2>}, {transform_indices = @transform_7, window_bounds = array<i64: 8, 2>}]} {
    %c0 = arith.constant 0 : index
    %c0_0 = arith.constant 0 : index
    %0 = vector.load %arg1[%c0, %c0_0] : memref<8x154xf32, #tpu.memory_space<vmem>>, vector<8x154xf32>
    %1 = arith.truncf %0 : vector<8x154xf32> to vector<8x154xbf16>
    %c0_1 = arith.constant 0 : index
    %c0_2 = arith.constant 0 : index
    %2 = vector.load %arg2[%c0_1, %c0_2] : memref<154x128xbf16, #tpu.memory_space<vmem>>, vector<154x128xbf16>
    %cst = arith.constant dense<0.000000e+00> : vector<8x128xf32>
    %3 = tpu.matmul %1, %2, %cst {dimension_numbers = #tpu.dot_dimension_numbers<[1], [0], [0], [1], [0, 0, 1, 1], [], []>} : vector<8x154xbf16>, vector<154x128xbf16>, vector<8x128xf32> -> vector<8x128xf32>
    %c0_3 = arith.constant 0 : index
    %c0_4 = arith.constant 0 : index
    %4 = vector.load %arg3[%c0_3, %c0_4] : memref<1x128xf32, #tpu.memory_space<vmem>>, vector<1x128xf32>
    %5 = vector.broadcast %4 : vector<1x128xf32> to vector<8x128xf32>
    %6 = arith.addf %3, %5 : vector<8x128xf32>
    %cst_5 = arith.constant 0.000000e+00 : f32
    %7 = vector.broadcast %cst_5 : f32 to vector<8x128xf32>
    %8 = arith.maximumf %6, %7 : vector<8x128xf32>
    %9 = arith.truncf %8 : vector<8x128xf32> to vector<8x128xbf16>
    %c0_6 = arith.constant 0 : index
    %c0_7 = arith.constant 0 : index
    %10 = vector.load %arg4[%c0_6, %c0_7] : memref<128x128xbf16, #tpu.memory_space<vmem>>, vector<128x128xbf16>
    %cst_8 = arith.constant dense<0.000000e+00> : vector<8x128xf32>
    %11 = tpu.matmul %9, %10, %cst_8 {dimension_numbers = #tpu.dot_dimension_numbers<[1], [0], [0], [1], [0, 0, 1, 1], [], []>} : vector<8x128xbf16>, vector<128x128xbf16>, vector<8x128xf32> -> vector<8x128xf32>
    %c0_9 = arith.constant 0 : index
    %c0_10 = arith.constant 0 : index
    %12 = vector.load %arg5[%c0_9, %c0_10] : memref<1x128xf32, #tpu.memory_space<vmem>>, vector<1x128xf32>
    %13 = vector.broadcast %12 : vector<1x128xf32> to vector<8x128xf32>
    %14 = arith.addf %11, %13 : vector<8x128xf32>
    %cst_11 = arith.constant 0.000000e+00 : f32
    %15 = vector.broadcast %cst_11 : f32 to vector<8x128xf32>
    %16 = arith.maximumf %14, %15 : vector<8x128xf32>
    %17 = arith.truncf %16 : vector<8x128xf32> to vector<8x128xbf16>
    %c0_12 = arith.constant 0 : index
    %c0_13 = arith.constant 0 : index
    %18 = vector.load %arg6[%c0_12, %c0_13] : memref<128x2xbf16, #tpu.memory_space<vmem>>, vector<128x2xbf16>
    %cst_14 = arith.constant dense<0.000000e+00> : vector<8x2xf32>
    %19 = tpu.matmul %17, %18, %cst_14 {dimension_numbers = #tpu.dot_dimension_numbers<[1], [0], [0], [1], [0, 0, 1, 1], [], []>} : vector<8x128xbf16>, vector<128x2xbf16>, vector<8x2xf32> -> vector<8x2xf32>
    %c0_15 = arith.constant 0 : index
    %c0_16 = arith.constant 0 : index
    %20 = vector.load %arg7[%c0_15, %c0_16] : memref<1x2xf32, #tpu.memory_space<vmem>>, vector<1x2xf32>
    %21 = vector.broadcast %20 : vector<1x2xf32> to vector<8x2xf32>
    %22 = arith.addf %19, %21 : vector<8x2xf32>
    %c0_17 = arith.constant 0 : index
    %c0_18 = arith.constant 0 : index
    %23 = vector.load %arg8[%c0_17, %c0_18] : memref<8x2xf32, #tpu.memory_space<vmem>>, vector<8x2xf32>
    tpu.vector_store %arg8[%c0_17, %c0_18], %22 {strides = array<i32>} : memref<8x2xf32, #tpu.memory_space<vmem>>, vector<8x2xf32>,
    return
  }
  func.func @transform_0(%arg0: i32) -> (i32, i32) {
    %c0_i32 = arith.constant 0 : i32
    %c0_i32_0 = arith.constant 0 : i32
    return %arg0, %c0_i32 : i32, i32
  }
  func.func @transform_1(%arg0: i32) -> (i32, i32) {
    %c0_i32 = arith.constant 0 : i32
    %c0_i32_0 = arith.constant 0 : i32
    %c0_i32_1 = arith.constant 0 : i32
    return %c0_i32, %c0_i32_0 : i32, i32
  }
  func.func @transform_2(%arg0: i32) -> (i32, i32) {
    %c0_i32 = arith.constant 0 : i32
    %c0_i32_0 = arith.constant 0 : i32
    %c0_i32_1 = arith.constant 0 : i32
    return %c0_i32, %c0_i32_0 : i32, i32
  }
  func.func @transform_3(%arg0: i32) -> (i32, i32) {
    %c0_i32 = arith.constant 0 : i32
    %c0_i32_0 = arith.constant 0 : i32
    %c0_i32_1 = arith.constant 0 : i32
    return %c0_i32, %c0_i32_0 : i32, i32
  }
  func.func @transform_4(%arg0: i32) -> (i32, i32) {
    %c0_i32 = arith.constant 0 : i32
    %c0_i32_0 = arith.constant 0 : i32
    %c0_i32_1 = arith.constant 0 : i32
    return %c0_i32, %c0_i32_0 : i32, i32
  }
  func.func @transform_5(%arg0: i32) -> (i32, i32) {
    %c0_i32 = arith.constant 0 : i32
    %c0_i32_0 = arith.constant 0 : i32
    %c0_i32_1 = arith.constant 0 : i32
    return %c0_i32, %c0_i32_0 : i32, i32
  }
  func.func @transform_6(%arg0: i32) -> (i32, i32) {
    %c0_i32 = arith.constant 0 : i32
    %c0_i32_0 = arith.constant 0 : i32
    %c0_i32_1 = arith.constant 0 : i32
    return %c0_i32, %c0_i32_0 : i32, i32
  }
  func.func @transform_7(%arg0: i32) -> (i32, i32) {
    %c0_i32 = arith.constant 0 : i32
    %c0_i32_0 = arith.constant 0 : i32
    return %arg0, %c0_i32 : i32, i32
  }
}

</mosaic_0001>

<bundles_post_ra>
// kernel: powerful_ordinal_nn_forward.1
= control target key start
LH: loop header
LB: loop body
LE: loop exit
PB: predicated region body
PF: predicated region fallthrough
CT: control target
= control target key end

     0   :  { %12 = vsyncpa [#allocation3], 0  ;;  %s892_s0 = inlined_call_operand.hbm [shape: f32[8,154], index: 0, kind: input, shape index: {}]   ;;  %s893_s1 = inlined_call_operand.vmem [shape: bf16[154,128], index: 1, kind: input, shape index: {}]   ;;  %s894_s2 = inlined_call_operand.hbm [shape: f32[1,128], index: 2, kind: input, shape index: {}]   ;;  %s895_s3 = inlined_call_operand.hbm [shape: bf16[128,128], index: 3, kind: input, shape index: {}]   ;;  %s896_s4 = inlined_call_operand.hbm [shape: f32[1,128], index: 4, kind: input, shape index: {}]   ;;  %s897_s5 = inlined_call_operand.vmem [shape: bf16[128,2], index: 5, kind: input, shape index: {}]   ;;  %s898_s6 = inlined_call_operand.hbm [shape: f32[1,2], index: 6, kind: input, shape index: {}]   ;;  %s899_s7 = inlined_call_operand.vmem [shape: f32[8,2], index: 7, kind: output, shape index: {}]  }
   0x1   :  { %13 = vsyncpa [#allocation5], 0 }
   0x2   :  { %14 = vsyncpa [#allocation8], 0  ;;  %s700_s24 = smov [#allocation4]   ;;  %s701_s26 = smov [#allocation7]  }
   0x3   :  { %s33_s25 = sshll.u32 %s700_s24, 4  ;;  %s55_s27 = sshll.u32 %s701_s26, 4  ;;  %s34_s25 = int_to_ptr.vmem [resolvable:$true] %s33_s25  ;;  %s56_s27 = int_to_ptr.vmem [resolvable:$true] %s55_s27 }
   0x4   :  { %s584_s30 = scalar_lea.hbm %s894_s2, 16 }
   0x5   :  { %p585_p0 = scmp.ne.s32.totalorder %s894_s2, %s584_s30  ;;  %p588_p1 = scmp.lt.u32.totalorder %s584_s30, %s894_s2 }
   0x7   :  { %p590_p2 = pnand %p588_p1, %p585_p0 }
   0x9   :  { %593 = shalt.err (!%p590_p2)
}
   0xa   :  { %s594_s12 = scalar_lea.vmem %s34_s25, 16  ;;  %s598_s13 = scalar_lea.vmem %s34_s25, 32 }
   0xb   :  { %p595_p3 = scmp.ne.s32.totalorder %s34_s25, %s594_s12  ;;  %p599_p4 = scmp.lt.s32.totalorder %s34_s25, %s34_s25 }
   0xc   :  { %p600_p5 = scmp.lt.s32.totalorder %s598_s13, %s594_s12 }
   0xe   :  { %p601_p6 = por %p600_p5, %p599_p4 }
  0x10   :  { %p602_p7 = pnand %p601_p6, %p595_p3 }
  0x12   :  { %605 = shalt.err (!%p602_p7)
}
  0x13   :  { %36 = dma.hbm_to_vmem [thread:$0]  %s894_s2, 16, %s34_s25, [#allocation5]  }
  0x14   :  { %s606_s18 = scalar_lea.hbm %s896_s4, 16 }
  0x15   :  { %p607_p8 = scmp.ne.s32.totalorder %s896_s4, %s606_s18  ;;  %p610_p9 = scmp.lt.u32.totalorder %s606_s18, %s896_s4 }
  0x17   :  { %p612_p10 = pnand %p610_p9, %p607_p8 }
  0x19   :  { %615 = shalt.err (!%p612_p10)
}
  0x1a   :  { %s616_s23 = scalar_lea.vmem %s56_s27, 16  ;;  %s620_s24 = scalar_lea.vmem %s56_s27, 32 }
  0x1b   :  { %p617_p11 = scmp.ne.s32.totalorder %s56_s27, %s616_s23  ;;  %p621_p12 = scmp.lt.s32.totalorder %s56_s27, %s56_s27 }
  0x1c   :  { %p622_p13 = scmp.lt.s32.totalorder %s620_s24, %s616_s23 }
  0x1e   :  { %p623_p0 = por %p622_p13, %p621_p12 }
  0x20   :  { %p624_p1 = pnand %p623_p0, %p617_p11 }
  0x22   :  { %627 = shalt.err (!%p624_p1)
}
  0x23   :  { %58 = dma.hbm_to_vmem [thread:$0]  %s896_s4, 16, %s56_s27, [#allocation8]  }
  0x24   :  { %s702_s26 = smov [#allocation2]   ;;  %s703_s29 = smov [#allocation6]  }
  0x25   :  { %s21_s28 = sshll.u32 %s702_s26, 4  ;;  %s42_s30 = sshll.u32 %s703_s29, 4  ;;  %s22_s28 = int_to_ptr.vmem [resolvable:$true] %s21_s28  ;;  %s774_s30 = int_to_ptr.vmem [resolvable:$true] %s42_s30 }
  0x26   :  { %s628_s10 = scalar_lea.hbm %s892_s0, 256 }
  0x27   :  { %p629_p2 = scmp.ne.s32.totalorder %s892_s0, %s628_s10  ;;  %p632_p3 = scmp.lt.u32.totalorder %s628_s10, %s892_s0 }
  0x29   :  { %p634_p4 = pnand %p632_p3, %p629_p2 }
  0x2b   :  { %637 = shalt.err (!%p634_p4)
}
  0x2c   :  { %s638_s4 = scalar_lea.vmem %s22_s28, 256  ;;  %p643_p6 = scmp.lt.s32.totalorder %s22_s28, %s22_s28 }
  0x2d   :  { %p639_p5 = scmp.ne.s32.totalorder %s22_s28, %s638_s4  ;;  %p644_p7 = scmp.lt.s32.totalorder %s638_s4, %s638_s4 }
  0x2f   :  { %p645_p8 = por %p644_p7, %p643_p6 }
  0x31   :  { %p646_p9 = pnand %p645_p8, %p639_p5 }
  0x33   :  { %649 = shalt.err (!%p646_p9)
}
  0x34   :  { %24 = dma.hbm_to_vmem [thread:$0]  %s892_s0, 256, %s22_s28, [#allocation3]  }
  0x35   :  { %s650_s18 = scalar_lea.hbm %s895_s3, 1024 }
  0x36   :  { %p651_p10 = scmp.ne.s32.totalorder %s895_s3, %s650_s18  ;;  %p654_p11 = scmp.lt.u32.totalorder %s650_s18, %s895_s3 }
  0x38   :  { %p656_p12 = pnand %p654_p11, %p651_p10 }
  0x3a   :  { %659 = shalt.err (!%p656_p12)
}
  0x3b   :  { %s660_s23 = scalar_lea.vmem %s774_s30, 1024  ;;  %p665_p0 = scmp.lt.s32.totalorder %s774_s30, %s774_s30 }
  0x3c   :  { %p661_p13 = scmp.ne.s32.totalorder %s774_s30, %s660_s23  ;;  %p666_p1 = scmp.lt.s32.totalorder %s660_s23, %s660_s23 }
  0x3e   :  { %p667_p2 = por %p666_p1, %p665_p0 }
  0x40   :  { %p668_p3 = pnand %p667_p2, %p661_p13 }
  0x42   :  { %671 = shalt.err (!%p668_p3)
}
  0x43   :  { %s704_s0 = smov 64   ;;  %s705_s24 = smov 4  }
  0x44   :  { %48 = dma.hbm_to_vmem [thread:$0]  %s895_s3, 1024, %s774_s30, [#allocation5], %s704_s0, %s704_s0, %s705_s24  }
  0x45   :  { %s706_s26 = smov [#allocation9]   ;;  %s672_s9 = scalar_lea.hbm %s898_s6, 16 }
  0x46   :  { %s67_s28 = sshll.u32 %s706_s26, 4  ;;  %p673_p4 = scmp.ne.s32.totalorder %s898_s6, %s672_s9  ;;  %s68_s28 = int_to_ptr.vmem [resolvable:$true] %s67_s28 }
  0x47   :  { %p676_p5 = scmp.lt.u32.totalorder %s672_s9, %s898_s6 }
  0x49   :  { %p678_p6 = pnand %p676_p5, %p673_p4 }
  0x4b   :  { %681 = shalt.err (!%p678_p6)
}
  0x4c   :  { %s682_s14 = scalar_lea.vmem %s68_s28, 16  ;;  %s686_s3 = scalar_lea.vmem %s68_s28, 32 }
  0x4d   :  { %p683_p7 = scmp.ne.s32.totalorder %s68_s28, %s682_s14  ;;  %p687_p8 = scmp.lt.s32.totalorder %s68_s28, %s68_s28 }
  0x4e   :  { %p688_p9 = scmp.lt.s32.totalorder %s686_s3, %s682_s14 }
  0x50   :  { %p689_p10 = por %p688_p9, %p687_p8 }
  0x52   :  { %p690_p11 = pnand %p689_p10, %p683_p7 }
  0x54   :  { %693 = shalt.err (!%p690_p11)
}
  0x55   :  { %70 = dma.hbm_to_vmem [thread:$0]  %s898_s6, 16, %s68_s28, [#allocation8]  }
  0x56   :  { %694 = dma.done.wait [#allocation3], 256  }
  0x57   :  { %695 = vsyncadd [#allocation3], 4294967040 }
  0x58   :  { %696 = dma.done.wait [#allocation5], 1040  }
  0x59   :  { %697 = vsyncadd [#allocation5], 4294966256 }
  0x5a   :  { %698 = dma.done.wait [#allocation8], 32  }
  0x5b   :  { %699 = vsyncadd [#allocation8], 4294967264  ;;  %v707_v0 = vmov 0   ;;  %v708_v1 = vmov 0.0   ;;  %v558_v2 = vld [vmem:[%s893_s1] sm:$0xff]   ;;  %v559_v3 = vld [vmem:[%s893_s1 + $0x8] sm:$0xff]  }
  0x5c   :  { %185 = vmatprep.subr.bf16.mxu0 %v707_v0  ;;  %508 = vmatprep.subr.bf16.mxu1 %v708_v1  ;;  %v560_v4 = vld [vmem:[%s893_s1 + $0x10] sm:$0xff]   ;;  %v561_v5 = vld [vmem:[%s893_s1 + $0x18] sm:$0xff]   ;;  %v88_v6 = vld [vmem:[#allocation2 + $0x8] sm:$0xff]  ;;  %vm177_vm0 = vcmask 211968   ;;  %vm181_vm1 = vcmask 1044480   ;;  %vm709_vm2 = vmmov 0  }
  0x5d   :  { %186 = vmatpush1.bf16.msra.mxu0 %v558_v2  ;;  %v90_v7 = vpack.c.bf16 %v88_v6, %v88_v6  ;;  %v568_v8 = vld [vmem:[#allocation6] sm:$0xff]   ;;  %v569_v9 = vld [vmem:[#allocation6 + $0x8] sm:$0xff]   ;;  %v563_v11 = vld [vmem:[%s893_s1 + $0x28] sm:$0xff]   ;;  %524 = vmatprep.mubr.msk.bf16.mxu1 %vm709_vm2, %v708_v1  ;;  %vm451_vm3 = vcmask 15360  }
  0x5e   :  { %187 = vmatprep.subr.bf16.mxu0 %v707_v0  ;;  %509 = vmatpush3.bf16.msra.mxu1 %v568_v8  ;;  %v562_v10 = vld [vmem:[%s893_s1 + $0x20] sm:$0xff]   ;;  %v571_v13 = vld [vmem:[#allocation6 + $0x18] sm:$0xff]   ;;  %v572_v15 = vld [vmem:[#allocation6 + $0x20] sm:$0xff]  }
  0x5f   :  { %471 = vmatprep.mubr.msk.bf16.mxu0 %vm177_vm0, %v90_v7  ;;  %510 = vmatprep.subr.bf16.mxu1 %v708_v1  ;;  %v570_v12 = vld [vmem:[#allocation6 + $0x10] sm:$0xff]   ;;  %v564_v14 = vld [vmem:[%s893_s1 + $0x30] sm:$0xff]   ;;  %v565_v16 = vld [vmem:[%s893_s1 + $0x38] sm:$0xff]  }
  0x60   :  { %v573_v17 = vld [vmem:[#allocation6 + $0x28] sm:$0xff]   ;;  %v567_v19 = vld [vmem:[%s893_s1 + $0x48] sm:$0x1f]   ;;  %v460_v25 = vld [vmem:[#allocation4] ss:$0 sm:$0xff] }
  0x61   :  { %188 = vmatpush1.bf16.msra.mxu0 %v559_v3  ;;  %v566_v18 = vld [vmem:[%s893_s1 + $0x40] sm:$0xff]   ;;  %v183_v21 = vsel %vm181_vm1, %v567_v19, 0  ;;  %v575_v24 = vld [vmem:[#allocation6 + $0x38] sm:$0xff]   ;;  %v579_v36 = vld [vmem:[%s897_s5 + $0x18] sm:$0xff]  }
  0x62   :  { %189 = vmatprep.subr.bf16.mxu0 %v707_v0  ;;  %511 = vmatpush3.bf16.msra.mxu1 %v569_v9  ;;  %v87_v20 = vld [vmem:[#allocation2] sm:$0xff]  ;;  %v577_v34 = vld [vmem:[%s897_s5 + $0x8] sm:$0xff]   ;;  %v578_v35 = vld [vmem:[%s897_s5 + $0x10] sm:$0xff]  }
  0x63   :  { %512 = vmatprep.subr.bf16.mxu1 %v708_v1  ;;  %v89_v22 = vpack.c.bf16 %v87_v20, %v87_v20  ;;  %v574_v23 = vld [vmem:[#allocation6 + $0x30] sm:$0xff]   ;;  %v582_v39 = vld [vmem:[%s897_s5 + $0x30] sm:$0xff]   ;;  %v583_v40 = vld [vmem:[%s897_s5 + $0x38] sm:$0xff]  }
  0x64   :  { %v576_v32 = vld [vmem:[%s897_s5] sm:$0xff]   ;;  %v581_v38 = vld [vmem:[%s897_s5 + $0x28] sm:$0xff]   ;;  %v472_v41 = vld [vmem:[#allocation7] ss:$0 sm:$0xff] }
  0x65   :  { %190 = vmatpush1.bf16.msra.mxu0 %v560_v4  ;;  %v580_v37 = vld [vmem:[%s897_s5 + $0x20] sm:$0xff]   ;;  %v481_v49 = vld [vmem:[#allocation9] ss:$0 sm:$0xff] }
  0x66   :  { %191 = vmatprep.subr.bf16.mxu0 %v707_v0  ;;  %513 = vmatpush3.bf16.msra.mxu1 %v570_v12 }
  0x67   :  { %514 = vmatprep.subr.bf16.mxu1 %v708_v1 }
  0x69   :  { %192 = vmatpush1.bf16.msra.mxu0 %v561_v5 }
  0x6a   :  { %193 = vmatprep.subr.bf16.mxu0 %v707_v0  ;;  %515 = vmatpush3.bf16.msra.mxu1 %v571_v13 }
  0x6b   :  { %516 = vmatprep.subr.bf16.mxu1 %v708_v1 }
  0x6d   :  { %194 = vmatpush1.bf16.msra.mxu0 %v562_v10 }
  0x6e   :  { %195 = vmatprep.subr.bf16.mxu0 %v707_v0  ;;  %517 = vmatpush3.bf16.msra.mxu1 %v572_v15 }
  0x6f   :  { %518 = vmatprep.subr.bf16.mxu1 %v708_v1 }
  0x71   :  { %196 = vmatpush1.bf16.msra.mxu0 %v563_v11 }
  0x72   :  { %197 = vmatprep.subr.bf16.mxu0 %v707_v0  ;;  %519 = vmatpush3.bf16.msra.mxu1 %v573_v17 }
  0x73   :  { %520 = vmatprep.subr.bf16.mxu1 %v708_v1 }
  0x75   :  { %198 = vmatpush1.bf16.msra.mxu0 %v564_v14 }
  0x76   :  { %199 = vmatprep.subr.bf16.mxu0 %v707_v0  ;;  %521 = vmatpush3.bf16.msra.mxu1 %v574_v23 }
  0x77   :  { %522 = vmatprep.subr.bf16.mxu1 %v708_v1 }
  0x79   :  { %200 = vmatpush1.bf16.msra.mxu0 %v565_v16 }
  0x7a   :  { %201 = vmatprep.subr.bf16.mxu0 %v707_v0  ;;  %523 = vmatpush3.bf16.msra.mxu1 %v575_v24 }
  0x7b   :  { %528 = vmatprep.subr.bf16.mxu1 %v708_v1 }
  0x7d   :  { %202 = vmatpush1.bf16.msra.mxu0 %v566_v18 }
  0x7e   :  { %203 = vmatprep.subr.bf16.mxu0 %v707_v0 }
  0x81   :  { %204 = vmatpush1.bf16.msra.mxu0 %v183_v21 }
  0x84   :  { %218 = vmatmul.mubr.bf16.vlgmr.msra.gmra.mrb[0].mxu0 %v89_v22 }
 0x157   :  { %v219_v26 = vpop.f32.mrb[0].mxu0 }
 0x158   :  { %v220_v27 = vadd.f32 %v460_v25, %v219_v26  ;;  %v221_v28 = vpop.f32.mrb[1].mxu0 }
 0x159   :  { %v222_v29 = vpop.f32.mrb[2].mxu0 }
 0x15a   :  { %v225_v30 = vmax.f32 %v220_v27, 0.0  ;;  %v223_v31 = vpop.f32.mrb[3].mxu0 }
 0x15c   :  { %v226_v33 = vpack.c.bf16 %v225_v30, %v225_v30 }
 0x15e   :  { %525 = vmatmul.mubr.bf16.vlgmr.msra.gmra.mrb[0].mxu1 %v226_v33 }
 0x15f   :  { %529 = vmatpush3.bf16.msra.mxu1 %v576_v32  ;;  %544 = vmatprep.mubr.msk.bf16.mxu1 %vm709_vm2, %v708_v1 }
 0x160   :  { %530 = vmatprep.subr.bf16.mxu1 %v708_v1 }
 0x163   :  { %531 = vmatpush3.bf16.msra.mxu1 %v577_v34 }
 0x164   :  { %532 = vmatprep.subr.bf16.mxu1 %v708_v1 }
 0x167   :  { %533 = vmatpush3.bf16.msra.mxu1 %v578_v35 }
 0x168   :  { %534 = vmatprep.subr.bf16.mxu1 %v708_v1 }
 0x16b   :  { %535 = vmatpush3.bf16.msra.mxu1 %v579_v36 }
 0x16c   :  { %536 = vmatprep.subr.bf16.mxu1 %v708_v1 }
 0x16f   :  { %537 = vmatpush3.bf16.msra.mxu1 %v580_v37 }
 0x170   :  { %538 = vmatprep.subr.bf16.mxu1 %v708_v1 }
 0x173   :  { %539 = vmatpush3.bf16.msra.mxu1 %v581_v38 }
 0x174   :  { %540 = vmatprep.subr.bf16.mxu1 %v708_v1 }
 0x177   :  { %541 = vmatpush3.bf16.msra.mxu1 %v582_v39 }
 0x178   :  { %542 = vmatprep.subr.bf16.mxu1 %v708_v1 }
 0x17b   :  { %543 = vmatpush3.bf16.msra.mxu1 %v583_v40 }
 0x231   :  { %v332_v42 = vpop.f32.mrb[0].mxu1 }
 0x232   :  { %v333_v43 = vadd.f32 %v472_v41, %v332_v42  ;;  %v526_v44 = vpop.f32.mrb[1].mxu1 }
 0x233   :  { %v335_v45 = vpop.f32.mrb[2].mxu1 }
 0x234   :  { %v338_v46 = vmax.f32 %v333_v43, 0.0  ;;  %v527_v47 = vpop.f32.mrb[3].mxu1 }
 0x236   :  { %v339_v48 = vpack.c.bf16 %v338_v46, %v338_v46 }
 0x238   :  { %545 = vmatmul.mubr.bf16.vlgmr.msra.gmra.mrb[4].mxu1 %v339_v48 }
 0x30b   :  { %v445_v50 = vpop.f32.mrb[4].mxu1 }
 0x30c   :  { %v446_v51 = vadd.f32 %v481_v49, %v445_v50  ;;  %v546_v52 = vpop.f32.mrb[5].mxu1 }
 0x30d   :  { %v448_v53 = vpop.f32.mrb[6].mxu1 }
 0x30e   :  { %452 = vst.msk [vmem:[%s899_s7] sm:$0xff] %vm451_vm3, %v446_v51  ;;  %v547_v54 = vpop.f32.mrb[7].mxu1 }
 0x30f   :  { %457 = vsyncpa [#allocation3], 1 }
 0x310   :  { %458 = vsyncpa [#allocation5], 1 }
 0x311   :  { %459 = vsyncpa [#allocation8], 1 }

</bundles_post_ra>
